<compile_context>
chip_gen: v5e
topology: v5e:2x2
jax: 0.10.0
libtpu: 0.0.40
codegen_flags: <defaults>
</compile_context>

<pallas_src>
import functools
import math

import jax
import jax.numpy as jnp
from jax.experimental import pallas as pl
from jax.experimental.pallas import tpu as pltpu


# ----------------------------------------------------------------------------
# GELU (tanh form) in f32 — tanh lowers to the EUP slot on all generations.
# ----------------------------------------------------------------------------
def _gelu(x):
    c = 0.7978845608028654  # sqrt(2/pi)
    return 0.5 * x * (1.0 + jnp.tanh(c * (x + 0.044715 * x * x * x)))


# ----------------------------------------------------------------------------
# Pallas kernel: one tile of flattened token rows per grid step.
#   xc:    (TS, bits)       f32 (cast to bf16 in-kernel for the MXU)
#   xb:    (TS, dim_model)  f32 (cast to bf16 in-kernel for the MXU)
#   scale: (B_pad, bits)    f32 constant-index table, "+1" already folded in
#   shift: (B_pad, bits)    f32 constant-index table
#   w*:    bf16 weights, b*: f32 bias rows
#   out:   (TS, bits)       out_dtype
# ----------------------------------------------------------------------------
def _predictor_kernel(xc_ref, xb_ref, scale_ref, shift_ref,
                      w1a_ref, w1b_ref, b1_ref, w2_ref, b2_ref, w3_ref, b3_ref,
                      out_ref, *, seq_len, tile_rows, batch_pad):
    i = pl.program_id(0)

    xc = xc_ref[...].astype(jnp.bfloat16)
    xb = xb_ref[...].astype(jnp.bfloat16)

    # linear1 on concat([x_corrupt, x_bert]) == xc @ W1[:bits] + xb @ W1[bits:]
    h = jnp.dot(xc, w1a_ref[...], preferred_element_type=jnp.float32)
    h = h + jnp.dot(xb, w1b_ref[...], preferred_element_type=jnp.float32)
    h = _gelu(h + b1_ref[...])                                   # (TS, 2*bits)

    h = _gelu(jnp.dot(h.astype(jnp.bfloat16), w2_ref[...],
                      preferred_element_type=jnp.float32) + b2_ref[...])
    h = _gelu(jnp.dot(h.astype(jnp.bfloat16), w3_ref[...],
                      preferred_element_type=jnp.float32) + b3_ref[...])

    # Per-row batch selection of the time modulation via a one-hot matmul:
    # row r belongs to batch b iff b*S <= r < (b+1)*S.  No integer division,
    # no gather, no per-token scale/shift HBM stream.  Padding rows (past N)
    # match no column -> scale = shift = 0 (masked on writeback anyway).
    row = (jax.lax.broadcasted_iota(jnp.int32, (tile_rows, batch_pad), 0)
           + i * tile_rows)
    col = jax.lax.broadcasted_iota(jnp.int32, (tile_rows, batch_pad), 1)
    start = col * seq_len
    onehot = ((row >= start) & (row < start + seq_len)).astype(jnp.float32)
    scale = jnp.dot(onehot, scale_ref[...],
                    preferred_element_type=jnp.float32)          # (TS, bits)
    shift = jnp.dot(onehot, shift_ref[...],
                    preferred_element_type=jnp.float32)          # (TS, bits)

    out_ref[...] = (scale * h + shift).astype(out_ref.dtype)


# ----------------------------------------------------------------------------
# Hardware introspection (defensive: falls back to conservative defaults).
# ----------------------------------------------------------------------------
def _tpu_topology():
    vmem_bytes = 64 << 20      # conservative (v7x-sized) default
    two_tc = False
    try:
        info = pltpu.get_tpu_info()
        vmem_bytes = int(getattr(info, "vmem_capacity_bytes", vmem_bytes))
        cores = (getattr(info, "num_cores", None)
                 or getattr(info, "tensorcores_per_chip", None))
        if cores is not None:
            two_tc = int(cores) >= 2
    except Exception:
        pass
    if not two_tc:
        try:
            kind = jax.devices()[0].device_kind.lower()
            two_tc = "7" in kind           # v7x parts have 2 TCs per chip
        except Exception:
            pass
    return vmem_bytes, two_tc


def _pick_tile_rows(n_rows, dim_model, batch_pad, vmem_bytes):
    """Largest sublane-friendly token tile.  128 MiB-VMEM parts (v5e/v6e) get
    bigger tiles (fewer ~0.35us grid steps); 64 MiB parts (v7x) stay at the
    conservative budget.  Also keeps the in-kernel one-hot block modest."""
    big_vmem = vmem_bytes >= (100 << 20)
    xb_cap = (8 << 20) if big_vmem else (4 << 20)   # f32 x_bert block cap
    ts_max = 2048 if big_vmem else 1024
    ts = min(ts_max, max(256, (xb_cap // (4 * max(dim_model, 1))) // 8 * 8))
    ts = min(ts, max(256, ((2 << 20) // (4 * max(batch_pad, 1))) // 8 * 8))
    ts = max(8, ts)
    if n_rows <= ts:
        ts = n_rows                        # single full-extent block
    return ts


def diffusion_predictor_forward(x_corrupt, time, x_bert, params,
                                out_dtype=jnp.float32):
    """x_corrupt: [B,S,bits], time: [B], x_bert: [B,S,dim_model] -> [B,S,bits]"""
    B, S, bits = x_corrupt.shape
    dim_model = x_bert.shape[-1]
    N = B * S

    sinu_w = params["sinu_w"]                 # (dim_time // 2,)
    wt1, bt1 = params["wt1"], params["bt1"]   # (dim_sinu, 2*dim_time), (2*dim_time,)
    wt2, bt2 = params["wt2"], params["bt2"]   # (2*dim_time, 2*bits), (2*bits,)
    w1, b1 = params["w1"], params["b1"]       # (bits+dim_model, 2*bits), (2*bits,)
    w2, b2 = params["w2"], params["b2"]       # (2*bits, bits), (bits,)
    w3, b3 = params["w3"], params["b3"]       # (bits, bits), (bits,)

    # --- glue (plain JAX): tiny time-MLP hoisted out of the kernel ----------
    tcol = time.astype(jnp.float32)[:, None]                  # (B, 1)
    freqs = tcol * sinu_w[None, :] * (2.0 * math.pi)          # (B, half)
    fouriered = jnp.concatenate([tcol, jnp.sin(freqs), jnp.cos(freqs)],
                                axis=-1)                      # (B, dim_sinu)
    te = jax.nn.gelu(fouriered @ wt1 + bt1, approximate=False)
    te = te @ wt2 + bt2                                       # (B, 2*bits)

    # Tiny per-batch modulation tables (constant-index kernel inputs).  The
    # "+1" of (scale + 1) * x + shift is folded into the scale table (exact).
    B_pad = max(8, ((B + 7) // 8) * 8)
    pad = B_pad - B
    scale_tab = jnp.pad((te[:, :bits] + 1.0).astype(jnp.float32),
                        ((0, pad), (0, 0)))                   # (B_pad, bits)
    shift_tab = jnp.pad(te[:, bits:].astype(jnp.float32),
                        ((0, pad), (0, 0)))                   # (B_pad, bits)

    # --- flatten tokens; keep activations f32 (cast to bf16 inside kernel) --
    xc2 = x_corrupt.reshape(N, bits).astype(jnp.float32)
    xb2 = x_bert.reshape(N, dim_model).astype(jnp.float32)

    w1a = w1[:bits].astype(jnp.bfloat16)                      # (bits, 2*bits)
    w1b = w1[bits:].astype(jnp.bfloat16)                      # (dim_model, 2*bits)
    w2b = w2.astype(jnp.bfloat16)
    w3b = w3.astype(jnp.bfloat16)
    as_row = lambda v: v.reshape(1, -1).astype(jnp.float32)
    b1r, b2r, b3r = as_row(b1), as_row(b2), as_row(b3)
    weights = [w1a, w1b, b1r, w2b, b2r, w3b, b3r]

    # --- tiling over flattened token rows ------------------------------------
    vmem_bytes, two_tc = _tpu_topology()
    TS = _pick_tile_rows(N, dim_model, B_pad, vmem_bytes)
    if two_tc and N >= 512 and pl.cdiv(N, TS) < 2:
        TS = ((N + 1) // 2 + 7) // 8 * 8     # 2-way split only on 2-TC parts
    grid = (pl.cdiv(N, TS),)

    act_spec = lambda feat: pl.BlockSpec((TS, feat), lambda i: (i, 0))
    wfull = lambda a: pl.BlockSpec(a.shape, lambda i: (0, 0))

    in_specs = ([act_spec(bits), act_spec(dim_model),
                 wfull(scale_tab), wfull(shift_tab)]
                + [wfull(w) for w in weights])

    kernel = functools.partial(_predictor_kernel,
                               seq_len=S, tile_rows=TS, batch_pad=B_pad)

    # advisory cost estimate (updated for the reduced traffic footprint)
    mm_flops = 2 * N * ((bits + dim_model) * 2 * bits
                        + 2 * bits * bits + bits * bits)
    sel_flops = 2 * N * B_pad * 2 * bits
    flops = mm_flops + sel_flops + 4 * N * bits
    transcendentals = N * 4 * bits
    weight_bytes = (2 * ((bits + dim_model) * 2 * bits + 2 * bits * bits
                         + bits * bits)
                    + 4 * 4 * bits + 2 * B_pad * bits * 4)
    out_bytes = N * bits * jnp.dtype(out_dtype).itemsize
    bytes_accessed = N * (bits + dim_model) * 4 + out_bytes + weight_bytes

    vmem_limit = (64 << 20) if vmem_bytes >= (100 << 20) else (32 << 20)

    out = pl.pallas_call(
        kernel,
        out_shape=jax.ShapeDtypeStruct((N, bits), out_dtype),
        grid=grid,
        in_specs=in_specs,
        out_specs=pl.BlockSpec((TS, bits), lambda i: (i, 0)),
        compiler_params=pltpu.CompilerParams(
            dimension_semantics=("parallel",),
            vmem_limit_bytes=vmem_limit),
        cost_estimate=pl.CostEstimate(flops=int(flops),
                                      transcendentals=int(transcendentals),
                                      bytes_accessed=int(bytes_accessed)),
    )(xc2, xb2, scale_tab, shift_tab, *weights)

    return out.reshape(B, S, bits)


# ----------------------------------------------------------------------------
# Pure-JAX reference (same semantics as the PyTorch module, exact erf GELU).
# ----------------------------------------------------------------------------
def reference_forward(x_corrupt, time, x_bert, params):
    bits = x_corrupt.shape[-1]
    gelu = lambda v: 0.5 * v * (1.0 + jax.scipy.special.erf(v / jnp.sqrt(2.0)))

    x = jnp.concatenate([x_corrupt, x_bert], axis=-1)
    x = gelu(x @ params["w1"] + params["b1"])
    x = gelu(x @ params["w2"] + params["b2"])
    x = gelu(x @ params["w3"] + params["b3"])

    tcol = time[:, None]
    freqs = tcol * params["sinu_w"][None, :] * 2.0 * math.pi
    fouriered = jnp.concatenate([tcol, jnp.sin(freqs), jnp.cos(freqs)], axis=-1)
    te = gelu(fouriered @ params["wt1"] + params["bt1"])
    te = te @ params["wt2"] + params["bt2"]
    scale_shift = te[:, None, :]
    scale, shift = scale_shift[..., :bits], scale_shift[..., bits:]
    return (scale + 1.0) * x + shift


# ----------------------------------------------------------------------------
# Deterministic parameter init (shapes from DiffusionPredictor.__init__).
# ----------------------------------------------------------------------------
def init_params(key, dim_model, dim_time, bits):
    dim_sinu = dim_time + 1

    def xavier(k, fan_in, fan_out):
        bound = math.sqrt(6.0 / (fan_in + fan_out))
        return jax.random.uniform(k, (fan_in, fan_out), jnp.float32,
                                  -bound, bound)

    def bias(k, fan_in, n):
        bound = 1.0 / math.sqrt(fan_in)
        return jax.random.uniform(k, (n,), jnp.float32, -bound, bound)

    ks = jax.random.split(key, 12)
    return {
        "sinu_w": jax.random.normal(ks[0], (dim_time // 2,), jnp.float32),
        "wt1": xavier(ks[1], dim_sinu, 2 * dim_time),
        "bt1": bias(ks[2], dim_sinu, 2 * dim_time),
        "wt2": xavier(ks[3], 2 * dim_time, 2 * bits),
        "bt2": bias(ks[4], 2 * dim_time, 2 * bits),
        "w1": xavier(ks[5], bits + dim_model, 2 * bits),
        "b1": bias(ks[6], bits + dim_model, 2 * bits),
        "w2": xavier(ks[7], 2 * bits, bits),
        "b2": bias(ks[8], 2 * bits, bits),
        "w3": xavier(ks[9], bits, bits),
        "b3": bias(ks[10], bits, bits),
    }


if __name__ == "__main__":
    B, S, dim_model, dim_time, bits = 2, 8, 32, 16, 16

    root = jax.random.PRNGKey(0)
    kp, kx, kt, kb = jax.random.split(root, 4)
    params = init_params(kp, dim_model, dim_time, bits)

    x_corrupt = jax.random.normal(kx, (B, S, bits), jnp.float32)
    time = jax.random.uniform(kt, (B,), jnp.float32)          # diffusion timestep
    x_bert = jax.random.normal(kb, (B, S, dim_model), jnp.float32)

    out = diffusion_predictor_forward(x_corrupt, time, x_bert, params)
    out = jax.block_until_ready(out)

    ref = reference_forward(x_corrupt, time, x_bert, params)
    assert out.shape == (B, S, bits)
    max_err = float(jnp.max(jnp.abs(out - ref)))
    # bf16 MXU operands + tanh-form GELU vs exact f32/erf reference:
    # observed error is O(5e-3); 2e-2 keeps a comfortable margin.
    assert max_err < 2e-2, f"mismatch vs reference: {max_err}"

    print("KERNEL_OK")
</pallas_src>

<mosaic_0001>
module attributes {stable_mosaic.version = 11 : i64} {
  func.func @_predictor_kernel(%arg0: i32, %arg1: memref<16x16xf32, #tpu.memory_space<vmem>>, %arg2: memref<16x32xf32, #tpu.memory_space<vmem>>, %arg3: memref<8x16xf32, #tpu.memory_space<vmem>>, %arg4: memref<8x16xf32, #tpu.memory_space<vmem>>, %arg5: memref<16x32xbf16, #tpu.memory_space<vmem>>, %arg6: memref<32x32xbf16, #tpu.memory_space<vmem>>, %arg7: memref<1x32xf32, #tpu.memory_space<vmem>>, %arg8: memref<32x16xbf16, #tpu.memory_space<vmem>>, %arg9: memref<1x16xf32, #tpu.memory_space<vmem>>, %arg10: memref<16x16xbf16, #tpu.memory_space<vmem>>, %arg11: memref<1x16xf32, #tpu.memory_space<vmem>>, %arg12: memref<16x16xf32, #tpu.memory_space<vmem>>) attributes {dimension_semantics = [#tpu.dimension_semantics<parallel>], iteration_bounds = array<i64: 1>, scalar_prefetch = 0 : i64, scratch_operands = 0 : i64, tpu.core_type = #tpu.core_type<tc>, window_params = [{transform_indices = @transform_0, window_bounds = array<i64: 16, 16>}, {transform_indices = @transform_1, window_bounds = array<i64: 16, 32>}, {pipeline_mode = #tpu.pipeline_mode<synchronous>, transform_indices = @transform_2, window_bounds = array<i64: 8, 16>}, {pipeline_mode = #tpu.pipeline_mode<synchronous>, transform_indices = @transform_3, window_bounds = array<i64: 8, 16>}, {pipeline_mode = #tpu.pipeline_mode<synchronous>, transform_indices = @transform_4, window_bounds = array<i64: 16, 32>}, {pipeline_mode = #tpu.pipeline_mode<synchronous>, transform_indices = @transform_5, window_bounds = array<i64: 32, 32>}, {pipeline_mode = #tpu.pipeline_mode<synchronous>, transform_indices = @transform_6, window_bounds = array<i64: 1, 32>}, {pipeline_mode = #tpu.pipeline_mode<synchronous>, transform_indices = @transform_7, window_bounds = array<i64: 32, 16>}, {pipeline_mode = #tpu.pipeline_mode<synchronous>, transform_indices = @transform_8, window_bounds = array<i64: 1, 16>}, {pipeline_mode = #tpu.pipeline_mode<synchronous>, transform_indices = @transform_9, window_bounds = array<i64: 16, 16>}, {pipeline_mode = #tpu.pipeline_mode<synchronous>, transform_indices = @transform_10, window_bounds = array<i64: 1, 16>}, {transform_indices = @transform_11, window_bounds = array<i64: 16, 16>}]} {
    %c0 = arith.constant 0 : index
    %c0_0 = arith.constant 0 : index
    %0 = vector.load %arg1[%c0, %c0_0] : memref<16x16xf32, #tpu.memory_space<vmem>>, vector<16x16xf32>
    %1 = arith.truncf %0 : vector<16x16xf32> to vector<16x16xbf16>
    %c0_1 = arith.constant 0 : index
    %c0_2 = arith.constant 0 : index
    %2 = vector.load %arg2[%c0_1, %c0_2] : memref<16x32xf32, #tpu.memory_space<vmem>>, vector<16x32xf32>
    %3 = arith.truncf %2 : vector<16x32xf32> to vector<16x32xbf16>
    %c0_3 = arith.constant 0 : index
    %c0_4 = arith.constant 0 : index
    %4 = vector.load %arg5[%c0_3, %c0_4] : memref<16x32xbf16, #tpu.memory_space<vmem>>, vector<16x32xbf16>
    %cst = arith.constant dense<0.000000e+00> : vector<16x32xf32>
    %5 = tpu.matmul %1, %4, %cst {dimension_numbers = #tpu.dot_dimension_numbers<[1], [0], [0], [1], [0, 0, 1, 1], [], []>} : vector<16x16xbf16>, vector<16x32xbf16>, vector<16x32xf32> -> vector<16x32xf32>
    %c0_5 = arith.constant 0 : index
    %c0_6 = arith.constant 0 : index
    %6 = vector.load %arg6[%c0_5, %c0_6] : memref<32x32xbf16, #tpu.memory_space<vmem>>, vector<32x32xbf16>
    %cst_7 = arith.constant dense<0.000000e+00> : vector<16x32xf32>
    %7 = tpu.matmul %3, %6, %cst_7 {dimension_numbers = #tpu.dot_dimension_numbers<[1], [0], [0], [1], [0, 0, 1, 1], [], []>} : vector<16x32xbf16>, vector<32x32xbf16>, vector<16x32xf32> -> vector<16x32xf32>
    %8 = arith.addf %5, %7 : vector<16x32xf32>
    %c0_8 = arith.constant 0 : index
    %c0_9 = arith.constant 0 : index
    %9 = vector.load %arg7[%c0_8, %c0_9] : memref<1x32xf32, #tpu.memory_space<vmem>>, vector<1x32xf32>
    %10 = vector.broadcast %9 : vector<1x32xf32> to vector<16x32xf32>
    %11 = arith.addf %8, %10 : vector<16x32xf32>
    %cst_10 = arith.constant 5.000000e-01 : f32
    %12 = vector.broadcast %cst_10 : f32 to vector<16x32xf32>
    %13 = arith.mulf %12, %11 : vector<16x32xf32>
    %cst_11 = arith.constant 4.471500e-02 : f32
    %14 = vector.broadcast %cst_11 : f32 to vector<16x32xf32>
    %15 = arith.mulf %14, %11 : vector<16x32xf32>
    %16 = arith.mulf %15, %11 : vector<16x32xf32>
    %17 = arith.mulf %16, %11 : vector<16x32xf32>
    %18 = arith.addf %11, %17 : vector<16x32xf32>
    %cst_12 = arith.constant 0.797884583 : f32
    %19 = vector.broadcast %cst_12 : f32 to vector<16x32xf32>
    %20 = arith.mulf %19, %18 : vector<16x32xf32>
    %21 = math.tanh %20 : vector<16x32xf32>
    %cst_13 = arith.constant 1.000000e+00 : f32
    %22 = vector.broadcast %cst_13 : f32 to vector<16x32xf32>
    %23 = arith.addf %22, %21 : vector<16x32xf32>
    %24 = arith.mulf %13, %23 : vector<16x32xf32>
    %25 = arith.truncf %24 : vector<16x32xf32> to vector<16x32xbf16>
    %c0_14 = arith.constant 0 : index
    %c0_15 = arith.constant 0 : index
    %26 = vector.load %arg8[%c0_14, %c0_15] : memref<32x16xbf16, #tpu.memory_space<vmem>>, vector<32x16xbf16>
    %cst_16 = arith.constant dense<0.000000e+00> : vector<16x16xf32>
    %27 = tpu.matmul %25, %26, %cst_16 {dimension_numbers = #tpu.dot_dimension_numbers<[1], [0], [0], [1], [0, 0, 1, 1], [], []>} : vector<16x32xbf16>, vector<32x16xbf16>, vector<16x16xf32> -> vector<16x16xf32>
    %c0_17 = arith.constant 0 : index
    %c0_18 = arith.constant 0 : index
    %28 = vector.load %arg9[%c0_17, %c0_18] : memref<1x16xf32, #tpu.memory_space<vmem>>, vector<1x16xf32>
    %29 = vector.broadcast %28 : vector<1x16xf32> to vector<16x16xf32>
    %30 = arith.addf %27, %29 : vector<16x16xf32>
    %cst_19 = arith.constant 5.000000e-01 : f32
    %31 = vector.broadcast %cst_19 : f32 to vector<16x16xf32>
    %32 = arith.mulf %31, %30 : vector<16x16xf32>
    %cst_20 = arith.constant 4.471500e-02 : f32
    %33 = vector.broadcast %cst_20 : f32 to vector<16x16xf32>
    %34 = arith.mulf %33, %30 : vector<16x16xf32>
    %35 = arith.mulf %34, %30 : vector<16x16xf32>
    %36 = arith.mulf %35, %30 : vector<16x16xf32>
    %37 = arith.addf %30, %36 : vector<16x16xf32>
    %cst_21 = arith.constant 0.797884583 : f32
    %38 = vector.broadcast %cst_21 : f32 to vector<16x16xf32>
    %39 = arith.mulf %38, %37 : vector<16x16xf32>
    %40 = math.tanh %39 : vector<16x16xf32>
    %cst_22 = arith.constant 1.000000e+00 : f32
    %41 = vector.broadcast %cst_22 : f32 to vector<16x16xf32>
    %42 = arith.addf %41, %40 : vector<16x16xf32>
    %43 = arith.mulf %32, %42 : vector<16x16xf32>
    %44 = arith.truncf %43 : vector<16x16xf32> to vector<16x16xbf16>
    %c0_23 = arith.constant 0 : index
    %c0_24 = arith.constant 0 : index
    %45 = vector.load %arg10[%c0_23, %c0_24] : memref<16x16xbf16, #tpu.memory_space<vmem>>, vector<16x16xbf16>
    %cst_25 = arith.constant dense<0.000000e+00> : vector<16x16xf32>
    %46 = tpu.matmul %44, %45, %cst_25 {dimension_numbers = #tpu.dot_dimension_numbers<[1], [0], [0], [1], [0, 0, 1, 1], [], []>} : vector<16x16xbf16>, vector<16x16xbf16>, vector<16x16xf32> -> vector<16x16xf32>
    %c0_26 = arith.constant 0 : index
    %c0_27 = arith.constant 0 : index
    %47 = vector.load %arg11[%c0_26, %c0_27] : memref<1x16xf32, #tpu.memory_space<vmem>>, vector<1x16xf32>
    %48 = vector.broadcast %47 : vector<1x16xf32> to vector<16x16xf32>
    %49 = arith.addf %46, %48 : vector<16x16xf32>
    %cst_28 = arith.constant 5.000000e-01 : f32
    %50 = vector.broadcast %cst_28 : f32 to vector<16x16xf32>
    %51 = arith.mulf %50, %49 : vector<16x16xf32>
    %cst_29 = arith.constant 4.471500e-02 : f32
    %52 = vector.broadcast %cst_29 : f32 to vector<16x16xf32>
    %53 = arith.mulf %52, %49 : vector<16x16xf32>
    %54 = arith.mulf %53, %49 : vector<16x16xf32>
    %55 = arith.mulf %54, %49 : vector<16x16xf32>
    %56 = arith.addf %49, %55 : vector<16x16xf32>
    %cst_30 = arith.constant 0.797884583 : f32
    %57 = vector.broadcast %cst_30 : f32 to vector<16x16xf32>
    %58 = arith.mulf %57, %56 : vector<16x16xf32>
    %59 = math.tanh %58 : vector<16x16xf32>
    %cst_31 = arith.constant 1.000000e+00 : f32
    %60 = vector.broadcast %cst_31 : f32 to vector<16x16xf32>
    %61 = arith.addf %60, %59 : vector<16x16xf32>
    %62 = arith.mulf %51, %61 : vector<16x16xf32>
    %63 = tpu.iota {dimensions = array<i32: 0>} : vector<16x8xi32>
    %c16_i32 = arith.constant 16 : i32
    %64 = arith.muli %arg0, %c16_i32 : i32
    %65 = vector.broadcast %64 : i32 to vector<16x8xi32>
    %66 = arith.addi %63, %65 : vector<16x8xi32>
    %67 = tpu.iota {dimensions = array<i32: 1>} : vector<16x8xi32>
    %c8_i32 = arith.constant 8 : i32
    %68 = vector.broadcast %c8_i32 : i32 to vector<16x8xi32>
    %69 = arith.muli %67, %68 : vector<16x8xi32>
    %70 = arith.cmpi sge, %66, %69 : vector<16x8xi32>
    %c8_i32_32 = arith.constant 8 : i32
    %71 = vector.broadcast %c8_i32_32 : i32 to vector<16x8xi32>
    %72 = arith.addi %69, %71 : vector<16x8xi32>
    %73 = arith.cmpi slt, %66, %72 : vector<16x8xi32>
    %74 = arith.andi %70, %73 : vector<16x8xi1>
    %75 = arith.extui %74 : vector<16x8xi1> to vector<16x8xi32>
    %76 = arith.sitofp %75 : vector<16x8xi32> to vector<16x8xf32>
    %c0_33 = arith.constant 0 : index
    %c0_34 = arith.constant 0 : index
    %77 = vector.load %arg3[%c0_33, %c0_34] : memref<8x16xf32, #tpu.memory_space<vmem>>, vector<8x16xf32>
    %cst_35 = arith.constant dense<0.000000e+00> : vector<16x16xf32>
    %78 = tpu.matmul %76, %77, %cst_35 {dimension_numbers = #tpu.dot_dimension_numbers<[1], [0], [0], [1], [0, 0, 1, 1], [], []>} : vector<16x8xf32>, vector<8x16xf32>, vector<16x16xf32> -> vector<16x16xf32>
    %c0_36 = arith.constant 0 : index
    %c0_37 = arith.constant 0 : index
    %79 = vector.load %arg4[%c0_36, %c0_37] : memref<8x16xf32, #tpu.memory_space<vmem>>, vector<8x16xf32>
    %cst_38 = arith.constant dense<0.000000e+00> : vector<16x16xf32>
    %80 = tpu.matmul %76, %79, %cst_38 {dimension_numbers = #tpu.dot_dimension_numbers<[1], [0], [0], [1], [0, 0, 1, 1], [], []>} : vector<16x8xf32>, vector<8x16xf32>, vector<16x16xf32> -> vector<16x16xf32>
    %81 = arith.mulf %78, %62 : vector<16x16xf32>
    %82 = arith.addf %81, %80 : vector<16x16xf32>
    %c0_39 = arith.constant 0 : index
    %c0_40 = arith.constant 0 : index
    %83 = vector.load %arg12[%c0_39, %c0_40] : memref<16x16xf32, #tpu.memory_space<vmem>>, vector<16x16xf32>
    tpu.vector_store %arg12[%c0_39, %c0_40], %82 {strides = array<i32>} : memref<16x16xf32, #tpu.memory_space<vmem>>, vector<16x16xf32>,
    return
  }
  func.func @transform_0(%arg0: i32) -> (i32, i32) {
    %c0_i32 = arith.constant 0 : i32
    %c0_i32_0 = arith.constant 0 : i32
    return %arg0, %c0_i32 : i32, i32
  }
  func.func @transform_1(%arg0: i32) -> (i32, i32) {
    %c0_i32 = arith.constant 0 : i32
    %c0_i32_0 = arith.constant 0 : i32
    return %arg0, %c0_i32 : i32, i32
  }
  func.func @transform_2(%arg0: i32) -> (i32, i32) {
    %c0_i32 = arith.constant 0 : i32
    %c0_i32_0 = arith.constant 0 : i32
    %c0_i32_1 = arith.constant 0 : i32
    return %c0_i32, %c0_i32_0 : i32, i32
  }
  func.func @transform_3(%arg0: i32) -> (i32, i32) {
    %c0_i32 = arith.constant 0 : i32
    %c0_i32_0 = arith.constant 0 : i32
    %c0_i32_1 = arith.constant 0 : i32
    return %c0_i32, %c0_i32_0 : i32, i32
  }
  func.func @transform_4(%arg0: i32) -> (i32, i32) {
    %c0_i32 = arith.constant 0 : i32
    %c0_i32_0 = arith.constant 0 : i32
    %c0_i32_1 = arith.constant 0 : i32
    return %c0_i32, %c0_i32_0 : i32, i32
  }
  func.func @transform_5(%arg0: i32) -> (i32, i32) {
    %c0_i32 = arith.constant 0 : i32
    %c0_i32_0 = arith.constant 0 : i32
    %c0_i32_1 = arith.constant 0 : i32
    return %c0_i32, %c0_i32_0 : i32, i32
  }
  func.func @transform_6(%arg0: i32) -> (i32, i32) {
    %c0_i32 = arith.constant 0 : i32
    %c0_i32_0 = arith.constant 0 : i32
    %c0_i32_1 = arith.constant 0 : i32
    return %c0_i32, %c0_i32_0 : i32, i32
  }
  func.func @transform_7(%arg0: i32) -> (i32, i32) {
    %c0_i32 = arith.constant 0 : i32
    %c0_i32_0 = arith.constant 0 : i32
    %c0_i32_1 = arith.constant 0 : i32
    return %c0_i32, %c0_i32_0 : i32, i32
  }
  func.func @transform_8(%arg0: i32) -> (i32, i32) {
    %c0_i32 = arith.constant 0 : i32
    %c0_i32_0 = arith.constant 0 : i32
    %c0_i32_1 = arith.constant 0 : i32
    return %c0_i32, %c0_i32_0 : i32, i32
  }
  func.func @transform_9(%arg0: i32) -> (i32, i32) {
    %c0_i32 = arith.constant 0 : i32
    %c0_i32_0 = arith.constant 0 : i32
    %c0_i32_1 = arith.constant 0 : i32
    return %c0_i32, %c0_i32_0 : i32, i32
  }
  func.func @transform_10(%arg0: i32) -> (i32, i32) {
    %c0_i32 = arith.constant 0 : i32
    %c0_i32_0 = arith.constant 0 : i32
    %c0_i32_1 = arith.constant 0 : i32
    return %c0_i32, %c0_i32_0 : i32, i32
  }
  func.func @transform_11(%arg0: i32) -> (i32, i32) {
    %c0_i32 = arith.constant 0 : i32
    %c0_i32_0 = arith.constant 0 : i32
    return %arg0, %c0_i32 : i32, i32
  }
}

</mosaic_0001>

<bundles_post_ra>
// kernel: tpu_custom_call.1
= control target key start
LH: loop header
LB: loop body
LE: loop exit
PB: predicated region body
PF: predicated region fallthrough
CT: control target
= control target key end

     0   :  { %16 = vsyncpa [#allocation3], 0  ;;  %s803_s0 = inlined_call_operand.vmem [shape: f32[16,16], index: 0, kind: input, shape index: {}]   ;;  %s804_s1 = inlined_call_operand.hbm [shape: f32[16,32], index: 1, kind: input, shape index: {}]   ;;  %s805_s2 = inlined_call_operand.vmem [shape: f32[8,16], index: 2, kind: input, shape index: {}]   ;;  %s806_s3 = inlined_call_operand.hbm [shape: f32[8,16], index: 3, kind: input, shape index: {}]   ;;  %s807_s4 = inlined_call_operand.hbm [shape: bf16[16,32], index: 4, kind: input, shape index: {}]   ;;  %s808_s5 = inlined_call_operand.hbm [shape: bf16[32,32], index: 5, kind: input, shape index: {}]   ;;  %s809_s6 = inlined_call_operand.hbm [shape: f32[1,32], index: 6, kind: input, shape index: {}]   ;;  %s810_s7 = inlined_call_operand.vmem [shape: bf16[32,16], index: 7, kind: input, shape index: {}]   ;;  %s811_s8 = inlined_call_operand.hbm [shape: f32[1,16], index: 8, kind: input, shape index: {}]   ;;  %s812_s9 = inlined_call_operand.vmem [shape: bf16[16,16], index: 9, kind: input, shape index: {}]   ;;  %s813_s10 = inlined_call_operand.vmem [shape: f32[1,16], index: 10, kind: input, shape index: {}]   ;;  %s814_s11 = inlined_call_operand.hbm [shape: f32[16,16], index: 11, kind: output, shape index: {}]  }
   0x1   :  { %17 = vsyncpa [#allocation6], 0 }
   0x2   :  { %18 = vsyncpa [#allocation9], 0 }
   0x3   :  { %19 = vsyncpa [#allocation12], 0  ;;  %s43_s19 = sshll.u32 %s806_s3, 4  ;;  %s44_s19 = int_to_ptr.hbm [resolvable:$true] %s43_s19 }
   0x4   :  { %20 = vsyncpa [#allocation4], 0  ;;  %s673_s20 = smov [#allocation5]   ;;  %s66_s24 = sshll.u32 %s808_s5, 4  ;;  %s67_s24 = int_to_ptr.hbm [resolvable:$true] %s66_s24 }
   0x5   :  { %s45_s21 = sshll.u32 %s673_s20, 4  ;;  %s674_s25 = smov [#allocation8]   ;;  %s46_s21 = int_to_ptr.vmem [resolvable:$true] %s45_s21 }
   0x6   :  { %48 = dma.hbm_to_vmem [thread:$0]  %s44_s19, 128, %s46_s21, [#allocation6]  }
   0x7   :  { %s68_s26 = sshll.u32 %s674_s25, 4  ;;  %s27_s29 = sshll.u32 %s804_s1, 4  ;;  %s69_s26 = int_to_ptr.vmem [resolvable:$true] %s68_s26  ;;  %s28_s29 = int_to_ptr.hbm [resolvable:$true] %s27_s29 }
   0x8   :  { %s675_s3 = smov 64   ;;  %s676_s30 = smov 4  }
   0x9   :  { %74 = dma.hbm_to_vmem [thread:$0]  %s67_s24, 256, %s69_s26, [#allocation9], %s675_s3, %s675_s3, %s676_s30  }
   0xa   :  { %s677_s12 = smov [#allocation2]   ;;  %s53_s16 = sshll.u32 %s807_s4, 4  ;;  %s54_s16 = int_to_ptr.hbm [resolvable:$true] %s53_s16 }
   0xb   :  { %s29_s13 = sshll.u32 %s677_s12, 4  ;;  %s678_s5 = smov 128   ;;  %s30_s13 = int_to_ptr.vmem [resolvable:$true] %s29_s13 }
   0xc   :  { %s679_s17 = smov 8   ;;  %s680_s1 = smov [#allocation7]  }
   0xd   :  { %35 = dma.hbm_to_vmem [thread:$0]  %s28_s29, 256, %s30_s13, [#allocation3], %s678_s5, %s678_s5, %s679_s17  }
   0xe   :  { %s55_s18 = sshll.u32 %s680_s1, 4  ;;  %s80_s21 = sshll.u32 %s809_s6, 4  ;;  %s56_s18 = int_to_ptr.vmem [resolvable:$true] %s55_s18  ;;  %s81_s21 = int_to_ptr.hbm [resolvable:$true] %s80_s21 }
   0xf   :  { %61 = dma.hbm_to_vmem [thread:$0]  %s54_s16, 128, %s56_s18, [#allocation6], %s675_s3, %s675_s3, %s676_s30  }
  0x10   :  { %s93_s4 = sshll.u32 %s811_s8, 4  ;;  %s681_s24 = smov [#allocation10]   ;;  %s94_s4 = int_to_ptr.hbm [resolvable:$true] %s93_s4 }
  0x11   :  { %s82_s25 = sshll.u32 %s681_s24, 4  ;;  %s682_s26 = smov [#allocation11]   ;;  %s83_s25 = int_to_ptr.vmem [resolvable:$true] %s82_s25 }
  0x12   :  { %85 = dma.hbm_to_vmem [thread:$0]  %s81_s21, 16, %s83_s25, [#allocation9]  }
  0x13   :  { %s95_s27 = sshll.u32 %s682_s26, 4  ;;  %s96_s27 = int_to_ptr.vmem [resolvable:$true] %s95_s27 }
  0x14   :  { %98 = dma.hbm_to_vmem [thread:$0]  %s94_s4, 16, %s96_s27, [#allocation12]  }
  0x15   :  { %663 = dma.done.wait [#allocation3], 256  }
  0x16   :  { %664 = vsyncadd [#allocation3], 4294967040 }
  0x17   :  { %665 = dma.done.wait [#allocation6], 256  }
  0x18   :  { %666 = vsyncadd [#allocation6], 4294967040 }
  0x19   :  { %667 = dma.done.wait [#allocation9], 272  }
  0x1a   :  { %668 = vsyncadd [#allocation9], 4294967024 }
  0x1b   :  { %669 = dma.done.wait [#allocation12], 16  }
  0x1c   :  { %670 = vsyncadd [#allocation12], 4294967280  ;;  %v462_v0 = vld [vmem:[#allocation8 + $0x8] sm:$0xff]  ;;  %v460_v1 = vld [vmem:[#allocation7] sm:$0xff]  ;;  %vm176_vm0 = vcmask 130048   ;;  %vm152_vm1 = vcmask 261120   ;;  %v322_v45 = vlaneseq }
  0x1d   :  { %v128_v2 = vld [vmem:[%s803_s0] sm:$0xff]  ;;  %v129_v3 = vld [vmem:[%s803_s0 + $0x8] sm:$0xff]  ;;  %162 = vmatpush.bf16.msra.mxu0 %v462_v0  ;;  %187 = vmatpush.bf16.msra.mxu1 %v460_v1  ;;  %v480_v12 = vld [vmem:[#allocation10] ss:$0 sm:$0xff]  ;;  %vm344_vm5 = vcmask 64512   ;;  %v683_v58 = vmov 0.0  }
  0x1e   :  { %v461_v4 = vld [vmem:[#allocation8] sm:$0xff]  ;;  %v130_v6 = vpack.c.bf16 %v129_v3, %v128_v2  ;;  %v132_v7 = vld [vmem:[#allocation2 + $0x8] sm:$0xff]  ;;  %v481_v40 = vld [vmem:[#allocation11] ss:$0 sm:$0xff]  ;;  %v323_v47 = vshrl.u32 %v322_v45, 7  ;;  %v330_v48 = vand.u32 127, %v322_v45 }
  0x1f   :  { %v131_v5 = vld [vmem:[#allocation2] sm:$0xff]  ;;  %v464_v9 = vld [vmem:[%s810_s7 + $0x8] sm:$0xff]  ;;  %v374_v43 = vld [vmem:[#allocation5] sm:$0xff]  ;;  %s410_s19 = sshll.u32 %s814_s11, 4  ;;  %s411_s19 = int_to_ptr.hbm [resolvable:$true] %s410_s19 }
  0x20   :  { %439 = vmatmul.msk.bf16.vlgmr.msra.gmra.mxu1 %vm176_vm0, %v130_v6  ;;  %v133_v8 = vpack.c.bf16 %v132_v7, %v131_v5  ;;  %248 = vmatpush.bf16.msra.mxu2 %v464_v9  ;;  %v463_v10 = vld [vmem:[%s810_s7] sm:$0xff]  ;;  %v331_v50 = vmul.u32 8, %v330_v48  ;;  %v324_v51 = vadd.s32 8, %v323_v47 }
  0x21   :  { %163 = vmatpush.bf16.msra.mxu0 %v461_v4  ;;  %v465_v39 = vld [vmem:[%s812_s9] sm:$0xff] }
  0x22   :  { %297 = vmatpush.bf16.msra.mxu3 %v465_v39  ;;  %v343_v44 = vld [vmem:[%s805_s2] sm:$0xff]  ;;  %vm332_vm2 = vcmp.ge.s32.totalorder %v323_v47, %v331_v50  ;;  %v334_v54 = vadd.s32 8, %v331_v50  ;;  %vm333_vm3 = vcmp.ge.s32.totalorder %v324_v51, %v331_v50 }
  0x23   :  { %466 = vmatpush.msrb.mxu1 %v343_v44 }
  0x24   :  { %434 = vmatmul.msk.bf16.vlgmr.msra.gmra.mxu0 %vm152_vm1, %v133_v8  ;;  %249 = vmatpush.bf16.msra.mxu2 %v463_v10  ;;  %vm335_vm4 = vcmp.lt.s32.totalorder %v323_v47, %v334_v54  ;;  %vm336_vm6 = vcmp.lt.s32.totalorder %v324_v51, %v334_v54 }
  0x25   :  { %366 = vmatpush.msrb.mxu0 %v343_v44  ;;  %vm337_vm7 = vmand %vm332_vm2, %vm335_vm4 }
  0x26   :  { %467 = vmatpush.msrb.mxu3 %v374_v43  ;;  %v454_v59 = vsel %vm337_vm7, 1.0, %v683_v58  ;;  %vm338_vm8 = vmand %vm333_vm3, %vm336_vm6 }
  0x27   :  { %v455_v62 = vsel %vm338_vm8, 1.0, %v683_v58 }
  0x28   :  { %390 = vmatpush.msrb.mxu2 %v374_v43 }
  0x30   :  { %457 = vmatmul.msk.f32.vlgmr.msrb.gmra.mxu1 %vm344_vm5, %v455_v62 }
  0x34   :  { %456 = vmatmul.msk.f32.vlgmr.msrb.gmra.mxu0 %vm344_vm5, %v454_v59 }
  0x9d   :  { %v189_v11 = vpop.f32.mrf.mxu1 }
  0xa1   :  { %v165_v13 = vpop.f32.mrf.mxu0 }
  0xa2   :  { %v190_v14 = vadd.f32 %v189_v11, %v165_v13  ;;  %v482_v11 = vld [vmem:[%s813_s10] ss:$0 sm:$0xff]  ;;  %s684_s10 = smov [#allocation13]  }
  0xa3   :  { %s408_s16 = sshll.u32 %s684_s10, 4  ;;  %s409_s16 = int_to_ptr.vmem [resolvable:$true] %s408_s16 }
  0xa4   :  { %v198_v15 = vadd.f32 %v480_v12, %v190_v14 }
  0xa5   :  { %v191_v18 = vpop.f32.mrf.mxu1 }
  0xa6   :  { %v202_v16 = vmul.f32 0.044715, %v198_v15  ;;  %v200_v33 = vmul.f32 0.5, %v198_v15 }
  0xa8   :  { %v204_v17 = vmul.f32 %v202_v16, %v198_v15 }
  0xa9   :  { %v167_v19 = vpop.f32.mrf.mxu0 }
  0xaa   :  { %v192_v20 = vadd.f32 %v191_v18, %v167_v19  ;;  %v206_v21 = vmul.f32 %v204_v17, %v198_v15 }
  0xac   :  { %v199_v22 = vadd.f32 %v480_v12, %v192_v20  ;;  %v208_v23 = vadd.f32 %v206_v21, %v198_v15 }
  0xae   :  { %v203_v24 = vmul.f32 0.044715, %v199_v22  ;;  %v210_v26 = vmul.f32 0.7978846, %v208_v23  ;;  %v201_v34 = vmul.f32 0.5, %v199_v22 }
  0xb0   :  { %v205_v25 = vmul.f32 %v203_v24, %v199_v22  ;;  %483 = vtanh.f32 %v210_v26 }
  0xb2   :  { %v207_v27 = vmul.f32 %v205_v25, %v199_v22 }
  0xb4   :  { %v209_v28 = vadd.f32 %v207_v27, %v199_v22 }
  0xb6   :  { %v211_v29 = vmul.f32 0.7978846, %v209_v28  ;;  %v484_v30 = vpop.eup %483 }
  0xb7   :  { %v214_v31 = vadd.f32 1.0, %v484_v30 }
  0xb8   :  { %485 = vtanh.f32 %v211_v29  ;;  %v368_v29 = vpop.f32.mrf.mxu0 }
  0xb9   :  { %v216_v36 = vmul.f32 %v214_v31, %v200_v33 }
  0xbe   :  { %v486_v32 = vpop.eup %485 }
  0xbf   :  { %v215_v35 = vadd.f32 1.0, %v486_v32 }
  0xc1   :  { %v217_v37 = vmul.f32 %v215_v35, %v201_v34 }
  0xc3   :  { %v218_v38 = vpack.c.bf16 %v217_v37, %v216_v36  ;;  %v371_v37 = vpop.f32.mrf.mxu1 }
  0xc5   :  { %448 = vmatmul.msk.bf16.vlgmr.msra.gmra.mxu2 %vm152_vm1, %v218_v38 }
  0xd5   :  { %458 = vmatmul.msk.f32.vlgmr.msrb.gmra.mxu2 %vm344_vm5, %v454_v59 }
 0x148   :  { %v251_v41 = vpop.f32.mrf.mxu2 }
 0x149   :  { %v252_v42 = vadd.f32 %v481_v40, %v251_v41 }
 0x14b   :  { %v258_v46 = vmul.f32 0.044715, %v252_v42  ;;  %v256_v5 = vmul.f32 0.5, %v252_v42 }
 0x14d   :  { %v260_v49 = vmul.f32 %v258_v46, %v252_v42 }
 0x14f   :  { %v262_v52 = vmul.f32 %v260_v49, %v252_v42 }
 0x150   :  { %v253_v53 = vpop.f32.mrf.mxu2 }
 0x151   :  { %v254_v55 = vadd.f32 %v481_v40, %v253_v53  ;;  %v264_v56 = vadd.f32 %v262_v52, %v252_v42 }
 0x153   :  { %v259_v57 = vmul.f32 0.044715, %v254_v55  ;;  %v266_v61 = vmul.f32 0.7978846, %v264_v56  ;;  %v257_v6 = vmul.f32 0.5, %v254_v55 }
 0x155   :  { %v261_v60 = vmul.f32 %v259_v57, %v254_v55  ;;  %487 = vtanh.f32 %v266_v61 }
 0x157   :  { %v263_v63 = vmul.f32 %v261_v60, %v254_v55 }
 0x158   :  { %v392_v31 = vpop.f32.mrf.mxu2 }
 0x159   :  { %v265_v0 = vadd.f32 %v263_v63, %v254_v55 }
 0x15b   :  { %v267_v1 = vmul.f32 0.7978846, %v265_v0  ;;  %v488_v2 = vpop.eup %487 }
 0x15c   :  { %v270_v3 = vadd.f32 1.0, %v488_v2 }
 0x15d   :  { %489 = vtanh.f32 %v267_v1 }
 0x15e   :  { %v272_v8 = vmul.f32 %v270_v3, %v256_v5 }
 0x163   :  { %v490_v4 = vpop.eup %489 }
 0x164   :  { %v271_v7 = vadd.f32 1.0, %v490_v4 }
 0x166   :  { %v273_v9 = vmul.f32 %v271_v7, %v257_v6 }
 0x168   :  { %v274_v10 = vpack.c.bf16 %v273_v9, %v272_v8 }
 0x16a   :  { %453 = vmatmul.msk.bf16.vlgmr.msra.gmra.mxu3 %vm176_vm0, %v274_v10 }
 0x17a   :  { %459 = vmatmul.msk.f32.vlgmr.msrb.gmra.mxu3 %vm344_vm5, %v455_v62 }
 0x1ed   :  { %v299_v12 = vpop.f32.mrf.mxu3 }
 0x1ee   :  { %v300_v13 = vadd.f32 %v482_v11, %v299_v12 }
 0x1f0   :  { %v306_v14 = vmul.f32 0.044715, %v300_v13  ;;  %v304_v27 = vmul.f32 0.5, %v300_v13 }
 0x1f2   :  { %v308_v15 = vmul.f32 %v306_v14, %v300_v13 }
 0x1f4   :  { %v310_v16 = vmul.f32 %v308_v15, %v300_v13 }
 0x1f5   :  { %v301_v17 = vpop.f32.mrf.mxu3 }
 0x1f6   :  { %v302_v18 = vadd.f32 %v482_v11, %v301_v17  ;;  %v312_v19 = vadd.f32 %v310_v16, %v300_v13 }
 0x1f8   :  { %v307_v20 = vmul.f32 0.044715, %v302_v18  ;;  %v314_v21 = vmul.f32 0.7978846, %v312_v19  ;;  %v305_v35 = vmul.f32 0.5, %v302_v18 }
 0x1fa   :  { %491 = vtanh.f32 %v314_v21  ;;  %v309_v22 = vmul.f32 %v307_v20, %v302_v18 }
 0x1fc   :  { %v311_v23 = vmul.f32 %v309_v22, %v302_v18 }
 0x1fd   :  { %v395_v39 = vpop.f32.mrf.mxu3 }
 0x1fe   :  { %v313_v24 = vadd.f32 %v311_v23, %v302_v18 }
 0x200   :  { %v492_v25 = vpop.eup %491  ;;  %v315_v26 = vmul.f32 0.7978846, %v313_v24 }
 0x201   :  { %v318_v28 = vadd.f32 1.0, %v492_v25 }
 0x202   :  { %493 = vtanh.f32 %v315_v26 }
 0x203   :  { %v320_v30 = vmul.f32 %v318_v28, %v304_v27 }
 0x205   :  { %v398_v32 = vmul.f32 %v368_v29, %v320_v30 }
 0x207   :  { %v400_v33 = vadd.f32 %v398_v32, %v392_v31 }
 0x208   :  { %v494_v34 = vpop.eup %493 }
 0x209   :  { %402 = vst.msk [vmem:[#allocation13] sm:$0xff] %vm176_vm0, %v400_v33  ;;  %v319_v36 = vadd.f32 1.0, %v494_v34 }
 0x20b   :  { %v321_v38 = vmul.f32 %v319_v36, %v305_v35 }
 0x20d   :  { %v399_v40 = vmul.f32 %v371_v37, %v321_v38 }
 0x20f   :  { %v401_v41 = vadd.f32 %v399_v40, %v395_v39 }
 0x211   :  { %403 = vst.msk [vmem:[#allocation13 + $0x8] sm:$0xff] %vm176_vm0, %v401_v41 }
 0x212   :  { %416 = dma.vmem_to_hbm [thread:$0]  %s409_s16, 256, %s411_s19, [#allocation4], %s678_s5, %s678_s5, %s679_s17  }
 0x213   :  { %671 = dma.done.wait [#allocation4], 256  }
 0x214   :  { %672 = vsyncadd [#allocation4], 4294967040 }
 0x215   :  { %421 = vsyncpa [#allocation3], 1 }
 0x216   :  { %422 = vsyncpa [#allocation6], 1 }
 0x217   :  { %423 = vsyncpa [#allocation9], 1 }
 0x218   :  { %424 = vsyncpa [#allocation12], 1 }
 0x219   :  { %425 = vsyncpa [#allocation4], 1 }

</bundles_post_ra>
